<compile_context>
chip_gen: v5e
topology: v5e:2x2
jax: 0.10.0
libtpu: 0.0.40
codegen_flags: <defaults>
</compile_context>

<pallas_src>
import jax
import jax.numpy as jnp
from jax.experimental import pallas as pl
from jax.experimental.pallas import tpu as pltpu

_LANE = 128
_TARGET_LANE_WIDTH = 1024            # wide, lane-dense last dim (multiple of 128)
_MAX_BLOCK_BYTES = 2 * 1024 * 1024   # ~2 MiB blocks -> near HBM roofline
_VMEM_LIMIT_BYTES = 48 * 1024 * 1024  # fits v7x (64 MiB physical) with headroom


def _round_up(x: int, m: int) -> int:
    return ((x + m - 1) // m) * m


def _decoder_passthrough_kernel(x_ref, o_ref):
    # Identity forward: the abstract Decoder defines no transformation.
    o_ref[...] = x_ref[...]


def _choose_tile_rows(rows: int, lane: int, itemsize: int) -> int:
    """Largest legal row-tile within the per-block VMEM budget."""
    budget_rows = max(1, _MAX_BLOCK_BYTES // (lane * itemsize))
    if rows <= budget_rows:
        # Whole-dim block always satisfies the (8, 128) BlockSpec rule.
        return rows
    # Multiple of 8 keeps the sublane divisibility constraint satisfied.
    tile = (budget_rows // 8) * 8
    return max(tile, 8)


def decoder_forward(x: jax.Array, *args) -> jax.Array:
    """Pallas implementation of Decoder.forward (identity pass-through).

    `x` may have arbitrary shape/dtype.  Extra *args mirror the PyTorch
    signature and are ignored, since the base class defines no use for them.
    """
    orig_shape = x.shape
    total = x.size
    if total == 0:
        return x

    itemsize = jnp.dtype(x.dtype).itemsize

    # Lane-dense 2-D slab: last dim is a wide multiple of 128.
    lane = min(_TARGET_LANE_WIDTH, _round_up(total, _LANE))
    rows = pl.cdiv(total, lane)
    tile_rows = _choose_tile_rows(rows, lane, itemsize)
    rows_padded = _round_up(rows, tile_rows)
    padded_total = rows_padded * lane

    flat = x.reshape(-1)
    if padded_total != total:
        flat = jnp.pad(flat, (0, padded_total - total))
    x2d = flat.reshape(rows_padded, lane)

    grid = rows_padded // tile_rows

    out2d = pl.pallas_call(
        _decoder_passthrough_kernel,
        out_shape=jax.ShapeDtypeStruct((rows_padded, lane), x2d.dtype),
        grid_spec=pltpu.PrefetchScalarGridSpec(
            num_scalar_prefetch=0,
            grid=(grid,),
            in_specs=[pl.BlockSpec((tile_rows, lane), lambda i: (i, 0))],
            out_specs=pl.BlockSpec((tile_rows, lane), lambda i: (i, 0)),
        ),
        compiler_params=pltpu.CompilerParams(
            dimension_semantics=("parallel",),
            vmem_limit_bytes=_VMEM_LIMIT_BYTES,
        ),
        # Pure-bandwidth custom call: help XLA's scheduler overlap it.
        cost_estimate=pl.CostEstimate(
            flops=0, transcendentals=0, bytes_accessed=2 * padded_total * itemsize
        ),
        # Identity copy: allow XLA to alias/drop the copy when donatable.
        input_output_aliases={0: 0},
    )(x2d)

    return out2d.reshape(-1)[:total].reshape(orig_shape)


if __name__ == "__main__":
    key = jax.random.PRNGKey(0)

    # Small NCHW input consistent with a generic decoder input.
    x = jax.random.normal(key, (2, 4, 16, 16), dtype=jnp.float32)
    y = decoder_forward(x)
    jax.block_until_ready(y)
    assert y.shape == x.shape
    assert jnp.allclose(y, x)

    # Awkward (non-multiple-of-128) shape to exercise the padded path.
    x_odd = jax.random.normal(jax.random.PRNGKey(1), (3, 5, 7, 9), dtype=jnp.float32)
    y_odd = decoder_forward(x_odd)
    jax.block_until_ready(y_odd)
    assert y_odd.shape == x_odd.shape
    assert jnp.allclose(y_odd, x_odd)

    # bf16 path (different itemsize / packing) to confirm dtype-agnostic tiling.
    x_bf16 = jax.random.normal(jax.random.PRNGKey(2), (2, 8, 32), dtype=jnp.bfloat16)
    y_bf16 = decoder_forward(x_bf16)
    jax.block_until_ready(y_bf16)
    assert y_bf16.shape == x_bf16.shape
    assert jnp.array_equal(y_bf16, x_bf16)

    print("KERNEL_OK")
</pallas_src>

<mosaic_0001>
module attributes {stable_mosaic.version = 11 : i64} {
  func.func @_decoder_passthrough_kernel(%arg0: i32, %arg1: memref<2x1024xf32, #tpu.memory_space<vmem>>, %arg2: memref<2x1024xf32, #tpu.memory_space<vmem>>) attributes {dimension_semantics = [#tpu.dimension_semantics<parallel>], iteration_bounds = array<i64: 1>, scalar_prefetch = 0 : i64, scratch_operands = 0 : i64, tpu.core_type = #tpu.core_type<tc>, window_params = [{transform_indices = @transform_0, window_bounds = array<i64: 2, 1024>}, {transform_indices = @transform_1, window_bounds = array<i64: 2, 1024>}]} {
    %c0 = arith.constant 0 : index
    %c0_0 = arith.constant 0 : index
    %0 = vector.load %arg1[%c0, %c0_0] : memref<2x1024xf32, #tpu.memory_space<vmem>>, vector<2x1024xf32>
    %c0_1 = arith.constant 0 : index
    %c0_2 = arith.constant 0 : index
    %1 = vector.load %arg2[%c0_1, %c0_2] : memref<2x1024xf32, #tpu.memory_space<vmem>>, vector<2x1024xf32>
    tpu.vector_store %arg2[%c0_1, %c0_2], %0 {strides = array<i32>} : memref<2x1024xf32, #tpu.memory_space<vmem>>, vector<2x1024xf32>,
    return
  }
  func.func @transform_0(%arg0: i32) -> (i32, i32) {
    %c0_i32 = arith.constant 0 : i32
    %c0_i32_0 = arith.constant 0 : i32
    return %arg0, %c0_i32 : i32, i32
  }
  func.func @transform_1(%arg0: i32) -> (i32, i32) {
    %c0_i32 = arith.constant 0 : i32
    %c0_i32_0 = arith.constant 0 : i32
    return %arg0, %c0_i32 : i32, i32
  }
}

</mosaic_0001>

<bundles_post_ra>
// kernel: tpu_custom_call.1
= control target key start
LH: loop header
LB: loop body
LE: loop exit
PB: predicated region body
PF: predicated region fallthrough
CT: control target
= control target key end

     0   :  { %6 = vsyncpa [#allocation3], 0  ;;  %s116_s0 = inlined_call_operand.hbm [shape: f32[2,1024], index: 0, kind: input, shape index: {}, may-alias: {0,1}]   ;;  %s117_s1 = inlined_call_operand.hbm [shape: f32[2,1024], index: 1, kind: output, shape index: {}, may-alias: {0,1}]  }
   0x1   :  { %7 = vsyncpa [#allocation4], 0  ;;  %s13_s8 = sshll.u32 %s116_s0, 4  ;;  %s98_s9 = smov [#allocation2]   ;;  %s14_s8 = int_to_ptr.hbm [resolvable:$true] %s13_s8 }
   0x2   :  { %s15_s10 = sshll.u32 %s98_s9, 4  ;;  %s16_s10 = int_to_ptr.vmem [resolvable:$true] %s15_s10 }
   0x3   :  { %18 = dma.hbm_to_vmem [thread:$0]  %s14_s8, 256, %s16_s10, [#allocation3]  }
   0x4   :  { %94 = dma.done.wait [#allocation3], 256  }
   0x5   :  { %95 = vsyncadd [#allocation3], 4294967040  ;;  %s99_s11 = smov [#allocation5]   ;;  %s34_s15 = sshll.u32 %s117_s1, 4  ;;  %v23_v0 = vld [vmem:[#allocation2] sm:$0xff]  ;;  %v24_v1 = vld [vmem:[#allocation2 + $0x8] sm:$0xff]  ;;  %s35_s15 = int_to_ptr.hbm [resolvable:$true] %s34_s15 }
   0x6   :  { %s32_s12 = sshll.u32 %s99_s11, 4  ;;  %25 = vst [vmem:[#allocation5] sm:$0xff] %v23_v0  ;;  %s33_s12 = int_to_ptr.vmem [resolvable:$true] %s32_s12 }
   0x7   :  { %26 = vst [vmem:[#allocation5 + $0x8] sm:$0xff] %v24_v1 }
   0x8   :  { %37 = dma.vmem_to_hbm [thread:$0]  %s33_s12, 256, %s35_s15, [#allocation4]  }
   0x9   :  { %96 = dma.done.wait [#allocation4], 256  }
   0xa   :  { %97 = vsyncadd [#allocation4], 4294967040 }
   0xb   :  { %42 = vsyncpa [#allocation3], 1 }
   0xc   :  { %43 = vsyncpa [#allocation4], 1 }

</bundles_post_ra>
